<compile_context>
chip_gen: v7x
topology: tpu7x:2x2x1
jax: 0.10.0
libtpu: 0.0.40
codegen_flags: <defaults>
</compile_context>

<pallas_src>
import math

import jax
import jax.numpy as jnp
from jax.experimental import pallas as pl
from jax.experimental.pallas import tpu as pltpu

_TILE_BYTES = 6 * 1024 * 1024      # per-buffer f32 row-tile budget
_VMEM_LIMIT = 32 * 1024 * 1024     # explicit scoped-VMEM budget (fits all gens)
_MIN_STEPS = 4                     # target minimum grid steps (megacore + overlap)


def _sv_scale_kernel(x_ref, w_ref, o_ref):
    # x_ref: (TR, C); w_ref: (1, C); o_ref: (TR, C).  Pure VPU elementwise; the
    # (1, C) weight row broadcasts over the sublane axis.
    o_ref[...] = x_ref[...] * w_ref[...]


def _choose_c(N, K):
    """Pick a lane-dense row width C (multiple of lcm(K, 128))."""
    quantum = (K * 128) // math.gcd(K, 128)          # lcm(K, 128)
    if N >= 32 * quantum:
        # Keep >= ~32 rows so TR >= 8 still yields >= _MIN_STEPS grid steps.
        c_cap = max(quantum, min(4096, (N // (32 * quantum)) * quantum))
    else:
        c_cap = quantum
    if N % quantum == 0:
        # Prefer a width dividing N exactly: the reshape is then a free view of
        # the contiguous input (no padding copy).  <= 32 iterations, trace-time.
        for t in range(c_cap // quantum, 0, -1):
            if N % (quantum * t) == 0:
                return quantum * t
    return c_cap


def _choose_tr(R, C):
    """Closed-form row tile: multiple of 8, <= ~_TILE_BYTES, >= _MIN_STEPS steps."""
    if R < 8:
        return R                                      # full-extent block (legal)
    tr_bytes = max(8, (_TILE_BYTES // (C * 4)) // 8 * 8)
    tr_steps = max(8, (R // _MIN_STEPS) // 8 * 8)
    return min(tr_bytes, tr_steps)


def sv_model_forward(x, weight):
    """x: (B, M, K); weight: (K, 1) (nn.Parameter([lowrank, 1])).

    Returns y with y[:, :, j] = x[:, :, j] * weight[j, 0], dtype float32.
    """
    B, M, K = x.shape
    N = B * M * K

    x_f32 = x.astype(jnp.float32)
    w_flat = weight.reshape(K).astype(jnp.float32)

    C = _choose_c(N, K)
    R = -(-N // C)                                    # cdiv
    total = R * C
    TR = _choose_tr(R, C)

    x_flat = x_f32.reshape(N)
    if total != N:
        # Zero-pad up to a whole number of lane-dense rows; sliced off afterwards.
        x_flat = jnp.pad(x_flat, (0, total - N))
    x2 = x_flat.reshape(R, C)

    # Row-major flatten => flat element f uses weight index f % K; since C % K == 0,
    # column c always uses w[c % K].  Pre-tile the weight once into a (1, C) row.
    w_row = jnp.tile(w_flat, C // K).reshape(1, C)

    grid = (pl.cdiv(R, TR),)

    y2 = pl.pallas_call(
        _sv_scale_kernel,
        out_shape=jax.ShapeDtypeStruct((R, C), jnp.float32),
        grid_spec=pltpu.PrefetchScalarGridSpec(
            num_scalar_prefetch=0,
            grid=grid,
            in_specs=[
                pl.BlockSpec((TR, C), lambda i: (i, 0)),
                pl.BlockSpec((1, C), lambda i: (0, 0)),   # weight row stays resident
            ],
            out_specs=pl.BlockSpec((TR, C), lambda i: (i, 0)),
        ),
        compiler_params=pltpu.CompilerParams(
            dimension_semantics=("parallel",),
            vmem_limit_bytes=_VMEM_LIMIT,
        ),
        cost_estimate=pl.CostEstimate(
            flops=total,
            transcendentals=0,
            bytes_accessed=2 * total * 4 + C * 4,
        ),
    )(x2, w_row)

    y_flat = y2.reshape(total)
    if total != N:
        y_flat = y_flat[:N]
    return y_flat.reshape(B, M, K)


# TODO(synk): the PyTorch `use_cuda` flag / `.cuda()` transfer has no TPU-side
# equivalent (device placement is handled by JAX); it is intentionally omitted.


if __name__ == "__main__":
    # Small shapes consistent with the forward: x is [B, M, K], lowrank = K = x.shape[2]
    B, M, K = 2, 16, 8
    key = jax.random.PRNGKey(0)
    x = jax.random.normal(key, (B, M, K), dtype=jnp.float32)

    # SV_Model.__init__ uses ones([lowrank, 1]); perturb deterministically so the
    # per-index scaling is actually exercised (still fully deterministic).
    weight = jnp.ones((K, 1), dtype=jnp.float32) + 0.1 * jnp.arange(
        K, dtype=jnp.float32
    ).reshape(K, 1)

    y = jax.block_until_ready(sv_model_forward(x, weight))

    # Reference (plain JAX): y[:, :, j] = x[:, :, j] * weight[j, 0]
    y_ref = x * weight[:, 0][None, None, :]
    assert y.shape == x.shape and y.dtype == jnp.float32
    assert jnp.allclose(y, y_ref, atol=1e-6, rtol=1e-6), "mismatch vs reference"

    print("KERNEL_OK")
</pallas_src>

<mosaic_0001>
module attributes {stable_mosaic.version = 11 : i64} {
  func.func @_sv_scale_kernel(%arg0: i32, %arg1: memref<2x128xf32, #tpu.memory_space<vmem>>, %arg2: memref<1x128xf32, #tpu.memory_space<vmem>>, %arg3: memref<2x128xf32, #tpu.memory_space<vmem>>) attributes {dimension_semantics = [#tpu.dimension_semantics<parallel>], iteration_bounds = array<i64: 1>, scalar_prefetch = 0 : i64, scratch_operands = 0 : i64, tpu.core_type = #tpu.core_type<tc>, window_params = [{transform_indices = @transform_0, window_bounds = array<i64: 2, 128>}, {pipeline_mode = #tpu.pipeline_mode<synchronous>, transform_indices = @transform_1, window_bounds = array<i64: 1, 128>}, {transform_indices = @transform_2, window_bounds = array<i64: 2, 128>}]} {
    %c0 = arith.constant 0 : index
    %c0_0 = arith.constant 0 : index
    %0 = vector.load %arg1[%c0, %c0_0] : memref<2x128xf32, #tpu.memory_space<vmem>>, vector<2x128xf32>
    %c0_1 = arith.constant 0 : index
    %c0_2 = arith.constant 0 : index
    %1 = vector.load %arg2[%c0_1, %c0_2] : memref<1x128xf32, #tpu.memory_space<vmem>>, vector<1x128xf32>
    %2 = vector.broadcast %1 : vector<1x128xf32> to vector<2x128xf32>
    %3 = arith.mulf %0, %2 : vector<2x128xf32>
    %c0_3 = arith.constant 0 : index
    %c0_4 = arith.constant 0 : index
    %4 = vector.load %arg3[%c0_3, %c0_4] : memref<2x128xf32, #tpu.memory_space<vmem>>, vector<2x128xf32>
    tpu.vector_store %arg3[%c0_3, %c0_4], %3 {strides = array<i32>} : memref<2x128xf32, #tpu.memory_space<vmem>>, vector<2x128xf32>,
    return
  }
  func.func @transform_0(%arg0: i32) -> (i32, i32) {
    %c0_i32 = arith.constant 0 : i32
    %c0_i32_0 = arith.constant 0 : i32
    return %arg0, %c0_i32 : i32, i32
  }
  func.func @transform_1(%arg0: i32) -> (i32, i32) {
    %c0_i32 = arith.constant 0 : i32
    %c0_i32_0 = arith.constant 0 : i32
    %c0_i32_1 = arith.constant 0 : i32
    return %c0_i32, %c0_i32_0 : i32, i32
  }
  func.func @transform_2(%arg0: i32) -> (i32, i32) {
    %c0_i32 = arith.constant 0 : i32
    %c0_i32_0 = arith.constant 0 : i32
    return %arg0, %c0_i32 : i32, i32
  }
}

</mosaic_0001>

<bundles_post_ra>
// kernel: tpu_custom_call.1
= control target key start
LH: loop header
LB: loop body
LE: loop exit
PB: predicated region body
PF: predicated region fallthrough
CT: control target
= control target key end

     0   :  { %7 = vsyncpa [#allocation3], 0  ;;  %s144_s0 = inlined_call_operand.hbm [shape: f32[2,128], index: 0, kind: input, shape index: {}]   ;;  %s145_s1 = inlined_call_operand.vmem [shape: f32[1,128], index: 1, kind: input, shape index: {}]   ;;  %s146_s2 = inlined_call_operand.hbm [shape: f32[2,128], index: 2, kind: output, shape index: {}]  }
   0x1   :  { %8 = vsyncpa [#allocation4], 0  ;;  %s100_s9 = smov [#allocation2]   ;;  %s52_s13 = scalar_lea.hbm %s144_s0, 32 }
   0x2   :  { %s15_s10 = sshll.u32 %s100_s9, 4  ;;  %p53_p0 = scmp.ne.s32.totalorder %s144_s0, %s52_s13  ;;  %s16_s10 = int_to_ptr.vmem [resolvable:$true] %s15_s10 }
   0x3   :  { %p56_p1 = scmp.lt.u32.totalorder %s52_s13, %s144_s0 }
   0x5   :  { %p58_p2 = pnand %p56_p1, %p53_p0 }
   0x7   :  { %61 = shalt.err (!%p58_p2)
}
   0x8   :  { %s62_s18 = scalar_lea.vmem %s16_s10, 32  ;;  %p67_p4 = scmp.lt.s32.totalorder %s16_s10, %s16_s10 }
   0x9   :  { %p63_p3 = scmp.ne.s32.totalorder %s16_s10, %s62_s18  ;;  %p68_p5 = scmp.lt.s32.totalorder %s62_s18, %s62_s18 }
   0xb   :  { %p69_p6 = por %p68_p5, %p67_p4 }
   0xd   :  { %p70_p7 = pnand %p69_p6, %p63_p3 }
   0xf   :  { %73 = shalt.err (!%p70_p7)
}
  0x10   :  { %18 = dma.hbm_to_vmem [thread:$0]  %s144_s0, 32, %s16_s10, [#allocation3]  }
  0x11   :  { %96 = dma.done.wait [#allocation3], 32  }
  0x12   :  { %97 = vsyncadd [#allocation3], 4294967264  ;;  %s101_s21 = smov [#allocation5]   ;;  %v24_v0 = vld [vmem:[#allocation2] sm:$0x3] }
  0x13   :  { %s40_s22 = sshll.u32 %s101_s21, 4  ;;  %v49_v1 = vld [vmem:[%s145_s1] ss:$0 sm:$0xff]  ;;  %s41_s22 = int_to_ptr.vmem [resolvable:$true] %s40_s22 }
  0x14   :  { %v32_v2 = vmul.f32 %v49_v1, %v24_v0  ;;  %s74_s25 = scalar_lea.vmem %s41_s22, 32  ;;  %p79_p9 = scmp.lt.s32.totalorder %s41_s22, %s41_s22 }
  0x15   :  { %p75_p8 = scmp.ne.s32.totalorder %s41_s22, %s74_s25  ;;  %p80_p10 = scmp.lt.s32.totalorder %s74_s25, %s74_s25 }
  0x16   :  { %33 = vst [vmem:[#allocation5] sm:$0x3] %v32_v2 }
  0x17   :  { %p81_p11 = por %p80_p10, %p79_p9 }
  0x19   :  { %p82_p12 = pnand %p81_p11, %p75_p8 }
  0x1b   :  { %85 = shalt.err (!%p82_p12)
}
  0x1c   :  { %s86_s27 = scalar_lea.hbm %s146_s2, 32 }
  0x1d   :  { %p87_p13 = scmp.ne.s32.totalorder %s146_s2, %s86_s27  ;;  %p90_p0 = scmp.lt.u32.totalorder %s86_s27, %s146_s2 }
  0x1f   :  { %p92_p1 = pnand %p90_p0, %p87_p13 }
  0x21   :  { %95 = shalt.err (!%p92_p1)
}
  0x22   :  { %43 = dma.vmem_to_hbm [thread:$0]  %s41_s22, 32, %s146_s2, [#allocation4]  }
  0x23   :  { %98 = dma.done.wait [#allocation4], 32  }
  0x24   :  { %99 = vsyncadd [#allocation4], 4294967264 }
  0x25   :  { %47 = vsyncpa [#allocation3], 1 }
  0x26   :  { %48 = vsyncpa [#allocation4], 1 }

</bundles_post_ra>
